<compile_context>
chip_gen: v5e
topology: v5e:2x2
jax: 0.10.0
libtpu: 0.0.40
codegen_flags: <defaults>
</compile_context>

<pallas_src>
import jax
import jax.numpy as jnp
from jax.experimental import pallas as pl
from jax.experimental.pallas import tpu as pltpu

_TILE_BYTES = 8 * 1024 * 1024          # per-tile budget; x2 buffers x (in+out) = 32 MiB
_VMEM_LIMIT_BYTES = 40 << 20           # explicit scoped-VMEM limit (fits every generation)
_LANE_CANDIDATES = (16384, 8192, 4096, 2048, 1024, 512, 256, 128)


def _copy_kernel(x_ref, o_ref):
    # ExtractItem has no arithmetic: the per-tile "compute" is identity.
    o_ref[...] = x_ref[...]


def _sublane_multiple(dtype) -> int:
    # Native sublane packing: 8 for 4-byte, 16 for 2-byte, 32 for 1-byte dtypes.
    itemsize = jnp.dtype(dtype).itemsize
    return max(8, 32 // max(1, itemsize))


def _pallas_identity_copy(x, *, donate: bool = False):
    """Materialize `x` into a fresh buffer via a tiled, pipelined Pallas copy."""
    size = x.size
    if size == 0:
        # Degenerate empty input: nothing for a kernel to do; still fresh.
        return jnp.copy(x)

    itemsize = jnp.dtype(x.dtype).itemsize
    flat = x.reshape(-1)

    # Widest lane-dense last dim (multiple of 128) that divides the flat size.
    lane = None
    for cand in _LANE_CANDIDATES:
        if size % cand == 0:
            lane = cand
            break

    pad = 0
    if lane is None:
        # Not lane-tileable without padding: pad to the next 128 multiple,
        # copy, and slice back (keeps the fresh-buffer contract).
        lane = 128
        padded = pl.cdiv(size, lane) * lane
        pad = padded - size
        flat = jnp.pad(flat, (0, pad))
        donate = False  # padded intermediate is not the caller's buffer

    padded_size = size + pad
    rows = padded_size // lane
    x2 = flat.reshape(rows, lane)

    # Row tile: biggest multiple of the dtype-native sublane count that keeps
    # the tile within the byte budget (or the full row dim if it already fits).
    sub = _sublane_multiple(x.dtype)
    max_rows = max(sub, _TILE_BYTES // (lane * itemsize))
    if rows <= max_rows:
        tr = rows                               # full-dim block: always legal
    else:
        tr = max(sub, (max_rows // sub) * sub)  # dtype-native sublane multiple

    grid = (pl.cdiv(rows, tr),)

    extra = {}
    if donate:
        extra["input_output_aliases"] = {0: 0}

    out2 = pl.pallas_call(
        _copy_kernel,
        out_shape=jax.ShapeDtypeStruct((rows, lane), x.dtype),
        grid=grid,
        in_specs=[pl.BlockSpec((tr, lane), lambda i: (i, 0))],
        out_specs=pl.BlockSpec((tr, lane), lambda i: (i, 0)),
        compiler_params=pltpu.CompilerParams(
            # "parallel" is free; on v7x it lets the grid shard across both
            # TensorCores, but the copy is HBM-bound so expect modest gains.
            dimension_semantics=("parallel",),
            vmem_limit_bytes=_VMEM_LIMIT_BYTES,
        ),
        cost_estimate=pl.CostEstimate(
            flops=0,
            transcendentals=0,
            bytes_accessed=2 * padded_size * itemsize,  # read + write
        ),
        **extra,
    )(x2)

    out_flat = out2.reshape(-1)
    if pad:
        out_flat = out_flat[:size]
    return out_flat.reshape(x.shape)


def extract_item(inputs, index, *, materialize=False, donate=False):
    """Pallas equivalent of ExtractItem.forward.

    Args:
      inputs: a single jax.Array, or a list/tuple of jax.Arrays.
      index: which item to extract (static Python int, like the module attr).
      materialize: if True, route the extracted array through the Pallas
        identity-copy kernel (fresh output buffer). If False (default,
        fastest), return the selected array directly — this exactly matches
        the PyTorch module, which returns the same tensor object.
      donate: if True (and materialize=True), alias input/output buffers so
        the copy becomes effectively free when the caller can donate input.
    """
    if isinstance(inputs, jax.Array):
        return inputs
    if isinstance(inputs, (list, tuple)):
        x = inputs[index]
        if materialize:
            return _pallas_identity_copy(x, donate=donate)
        return x
    raise TypeError(
        f"input must be a list or tuple of arrays, but got: {type(inputs)}."
    )


if __name__ == "__main__":
    key = jax.random.PRNGKey(0)
    k0, k1, k2, k3, k4 = jax.random.split(key, 5)

    # Small NCHW-style shapes consistent with the module's typical usage.
    xs = [jax.random.normal(k, (2, 4, 16, 16), dtype=jnp.float32) for k in (k0, k1, k2)]
    index = 1

    # 1) Pallas copy path (materialize=True) on the main example.
    y = jax.block_until_ready(extract_item(xs, index, materialize=True))
    ref = xs[index]
    assert y.shape == ref.shape and y.dtype == ref.dtype
    assert bool(jnp.array_equal(y, ref))

    # 2) Narrow-dtype (bf16) extraction through the kernel.
    xb = [jax.random.normal(k3, (2, 16, 64, 64), dtype=jnp.bfloat16),
          jax.random.normal(k4, (2, 16, 64, 64), dtype=jnp.bfloat16)]
    yb = jax.block_until_ready(extract_item(xb, 0, materialize=True))
    assert bool(jnp.array_equal(yb, xb[0]))

    # 3) Non-128-divisible size exercises the padded fallback (still a fresh
    #    Pallas-produced buffer, no silent passthrough).
    xo = [jnp.arange(3 * 5 * 7, dtype=jnp.float32).reshape(3, 5, 7),
          jnp.ones((3, 5, 7), dtype=jnp.float32)]
    yo = jax.block_until_ready(extract_item(xo, -1, materialize=True))
    assert bool(jnp.array_equal(yo, xo[-1]))

    # 4) Passthrough semantics (single tensor, tuple, negative index): zero-copy.
    assert extract_item(xs[0], 0) is xs[0]
    assert extract_item(tuple(xs), -1) is xs[-1]
    assert extract_item(xs, index) is xs[index]

    print("KERNEL_OK")
</pallas_src>

<mosaic_0001>
module attributes {stable_mosaic.version = 11 : i64} {
  func.func @_copy_kernel(%arg0: i32, %arg1: memref<1x2048xf32, #tpu.memory_space<vmem>>, %arg2: memref<1x2048xf32, #tpu.memory_space<vmem>>) attributes {dimension_semantics = [#tpu.dimension_semantics<parallel>], iteration_bounds = array<i64: 1>, scalar_prefetch = 0 : i64, scratch_operands = 0 : i64, tpu.core_type = #tpu.core_type<tc>, window_params = [{transform_indices = @transform_0, window_bounds = array<i64: 1, 2048>}, {transform_indices = @transform_1, window_bounds = array<i64: 1, 2048>}]} {
    %c0 = arith.constant 0 : index
    %c0_0 = arith.constant 0 : index
    %0 = vector.load %arg1[%c0, %c0_0] : memref<1x2048xf32, #tpu.memory_space<vmem>>, vector<1x2048xf32>
    %c0_1 = arith.constant 0 : index
    %c0_2 = arith.constant 0 : index
    %1 = vector.load %arg2[%c0_1, %c0_2] : memref<1x2048xf32, #tpu.memory_space<vmem>>, vector<1x2048xf32>
    tpu.vector_store %arg2[%c0_1, %c0_2], %0 {strides = array<i32>} : memref<1x2048xf32, #tpu.memory_space<vmem>>, vector<1x2048xf32>,
    return
  }
  func.func @transform_0(%arg0: i32) -> (i32, i32) {
    %c0_i32 = arith.constant 0 : i32
    %c0_i32_0 = arith.constant 0 : i32
    return %arg0, %c0_i32 : i32, i32
  }
  func.func @transform_1(%arg0: i32) -> (i32, i32) {
    %c0_i32 = arith.constant 0 : i32
    %c0_i32_0 = arith.constant 0 : i32
    return %arg0, %c0_i32 : i32, i32
  }
}

</mosaic_0001>

<bundles_post_ra>
// kernel: tpu_custom_call.1
= control target key start
LH: loop header
LB: loop body
LE: loop exit
PB: predicated region body
PF: predicated region fallthrough
CT: control target
= control target key end

     0   :  { %6 = vsyncpa [#allocation3], 0  ;;  %s116_s0 = inlined_call_operand.hbm [shape: f32[1,2048], index: 0, kind: input, shape index: {}]   ;;  %s117_s1 = inlined_call_operand.hbm [shape: f32[1,2048], index: 1, kind: output, shape index: {}]  }
   0x1   :  { %7 = vsyncpa [#allocation4], 0  ;;  %s13_s8 = sshll.u32 %s116_s0, 4  ;;  %s98_s9 = smov [#allocation2]   ;;  %s14_s8 = int_to_ptr.hbm [resolvable:$true] %s13_s8 }
   0x2   :  { %s15_s10 = sshll.u32 %s98_s9, 4  ;;  %s16_s10 = int_to_ptr.vmem [resolvable:$true] %s15_s10 }
   0x3   :  { %18 = dma.hbm_to_vmem [thread:$0]  %s14_s8, 256, %s16_s10, [#allocation3]  }
   0x4   :  { %94 = dma.done.wait [#allocation3], 256  }
   0x5   :  { %95 = vsyncadd [#allocation3], 4294967040  ;;  %s99_s11 = smov [#allocation5]   ;;  %s34_s15 = sshll.u32 %s117_s1, 4  ;;  %v23_v0 = vld [vmem:[#allocation2] sm:$0xff]  ;;  %v24_v1 = vld [vmem:[#allocation2 + $0x8] sm:$0xff]  ;;  %s35_s15 = int_to_ptr.hbm [resolvable:$true] %s34_s15 }
   0x6   :  { %s32_s12 = sshll.u32 %s99_s11, 4  ;;  %25 = vst [vmem:[#allocation5] sm:$0xff] %v23_v0  ;;  %s33_s12 = int_to_ptr.vmem [resolvable:$true] %s32_s12 }
   0x7   :  { %26 = vst [vmem:[#allocation5 + $0x8] sm:$0xff] %v24_v1 }
   0x8   :  { %37 = dma.vmem_to_hbm [thread:$0]  %s33_s12, 256, %s35_s15, [#allocation4]  }
   0x9   :  { %96 = dma.done.wait [#allocation4], 256  }
   0xa   :  { %97 = vsyncadd [#allocation4], 4294967040 }
   0xb   :  { %42 = vsyncpa [#allocation3], 1 }
   0xc   :  { %43 = vsyncpa [#allocation4], 1 }

</bundles_post_ra>
